<compile_context>
chip_gen: v7x
topology: tpu7x:2x2x1
jax: 0.10.0
libtpu: 0.0.40
codegen_flags: <defaults>
</compile_context>

<pallas_src>
import math

import jax
import jax.numpy as jnp
from jax.experimental import pallas as pl
from jax.experimental.pallas import tpu as pltpu


def _round_up(a: int, m: int) -> int:
    return ((a + m - 1) // m) * m


def _pow2_floor(v: int) -> int:
    return 1 << (int(v).bit_length() - 1)


def _fold_to_128_lanes(v):
    """(rows, W) -> (rows, 128) via lane-aligned pairwise adds (W = power of two)."""
    w = v.shape[-1]
    while w > 128:
        h = w // 2
        v = v[:, :h] + v[:, h:]
        w = h
    return v


def _nca_sums_kernel(x_ref, labels_ref, y_ref, pz_ref):
    """Accumulate lane-dense partial sums of exp(x): same-label (p) and total (z)."""
    k = pl.program_id(2)  # memory-bank reduction axis — innermost

    @pl.when(k == 0)
    def _init():
        pz_ref[...] = jnp.zeros_like(pz_ref)

    x = x_ref[...].astype(jnp.float32)   # (tb, tn) upcast in-register (bf16 input OK)
    labels = labels_ref[...]             # (1, tn)  int32
    y = y_ref[...]                       # (tb, 1)  int32  (= labels[indexes])

    e = jnp.exp(x)                       # EUP slot
    p = jnp.where(labels == y, e, 0.0)   # same-label contributions (VPU cmp+select)

    # NOTE: the "self" column is intentionally NOT masked here; it contributes
    # equally to p and z (labels[indexes[i]] == y[i]) and is subtracted exactly
    # once in the O(B) JAX epilogue.  Saves ~2-3 VPU ops/element.
    pz_ref[:, 0:128] += _fold_to_128_lanes(p)
    pz_ref[:, 128:256] += _fold_to_128_lanes(e)


def nca_cross_entropy(x, indexes, labels, margin: float = 0.0,
                      *, block_b: int | None = None, block_n: int | None = None):
    """Forward pass of NCACrossEntropy. Returns a scalar f32 loss."""
    B, n = x.shape
    labels = labels.astype(jnp.int32)
    indexes = indexes.astype(jnp.int32)
    y = labels[indexes]                                   # (B,)

    itemsize = jnp.dtype(x.dtype).itemsize
    row_align = 16 if itemsize == 2 else 8                # bf16 sublane packing
    if block_b is None:
        block_b = _round_up(min(B, 128), row_align)
    if block_n is None:
        # Double-buffered x tile budget of 12 MiB -> fits v7x's 64 MiB VMEM with
        # plenty of headroom while keeping per-grid-step DMAs in the >85%-of-
        # roofline regime on v5e/v6e.
        budget_elems = (12 * 1024 * 1024) // (2 * block_b * itemsize)
        block_n = max(128, min(8192, _pow2_floor(max(budget_elems, 128))))
        if n >= 128:
            block_n = min(block_n, _pow2_floor(n))
    assert block_n % 128 == 0 and (block_n & (block_n - 1)) == 0

    n_main = (n // block_n) * block_n      # aligned prefix handled by the kernel
    k_total = n_main // block_n
    row_tiles = pl.cdiv(B, block_b)

    if k_total > 0:
        # If the batch gives only one row tile, split the memory-bank axis into a
        # leading parallel axis so the grid can shard across v7x's 2 TensorCores.
        n_splits = 2 if (row_tiles == 1 and k_total >= 2 and k_total % 2 == 0) else 1
        k_tiles = k_total // n_splits

        labels2d = labels.reshape(1, n)
        y2d = y.reshape(B, 1)

        cost = pl.CostEstimate(
            flops=4 * B * n_main,
            transcendentals=B * n_main,
            bytes_accessed=B * n_main * itemsize + n * 4 + B * 4
            + B * n_splits * 256 * 4,
        )

        pz = pl.pallas_call(
            _nca_sums_kernel,
            out_shape=jax.ShapeDtypeStruct((B, n_splits * 256), jnp.float32),
            grid_spec=pl.GridSpec(
                grid=(n_splits, row_tiles, k_tiles),
                in_specs=[
                    # x: native dtype, no padded copy; only aligned column blocks
                    # are ever addressed (the ragged tail is handled in JAX).
                    pl.BlockSpec((block_b, block_n),
                                 lambda s, i, k: (i, s * k_tiles + k)),
                    pl.BlockSpec((1, block_n),
                                 lambda s, i, k: (0, s * k_tiles + k)),
                    pl.BlockSpec((block_b, 1), lambda s, i, k: (i, 0)),
                ],
                # Lane-dense stacked output: [:, :128] = p partials, [:, 128:] = z.
                out_specs=pl.BlockSpec((block_b, 256), lambda s, i, k: (i, s)),
            ),
            compiler_params=pltpu.CompilerParams(
                dimension_semantics=("parallel", "parallel", "arbitrary"),
                vmem_limit_bytes=48 * 1024 * 1024,   # <= v7x 64 MiB physical
            ),
            cost_estimate=cost,
        )(x, labels2d, y2d)

        pz4 = pz.reshape(B, n_splits, 2, 128)
        p_sum = jnp.sum(pz4[:, :, 0, :], axis=(1, 2))
        z_sum = jnp.sum(pz4[:, :, 1, :], axis=(1, 2))
    else:
        p_sum = jnp.zeros((B,), jnp.float32)
        z_sum = jnp.zeros((B,), jnp.float32)

    if n_main < n:
        # Unaligned column remainder (< block_n columns): negligible traffic,
        # computed in plain JAX so the kernel never reads out-of-bounds columns.
        x_t = x[:, n_main:].astype(jnp.float32)
        e_t = jnp.exp(x_t)
        same_t = labels[n_main:][None, :] == y[:, None]
        p_sum = p_sum + jnp.sum(jnp.where(same_t, e_t, 0.0), axis=1)
        z_sum = z_sum + jnp.sum(e_t, axis=1)

    # Exact exclusion of the self column (counted once in both p_sum and z_sum).
    # TODO(synk): if a query's class has no other member in the memory bank the
    # true p is exactly 0; the subtraction leaves O(ulp) noise instead of an
    # exact 0 (PyTorch drops prob==0 rows via masked_select).
    e_self = jnp.exp(x[jnp.arange(B), indexes].astype(jnp.float32))
    p = jnp.maximum(p_sum - e_self, 0.0)
    z = z_sum - e_self

    z_exclude = z - p
    p_m = p / math.exp(margin)
    Z = z_exclude + p_m
    prob = p_m / Z
    nz = prob != 0
    loss = jnp.sum(jnp.where(nz, jnp.log(jnp.where(nz, prob, 1.0)), 0.0))
    return -loss / B


def nca_cross_entropy_ref(x, indexes, labels, margin: float = 0.0):
    """Pure-JAX reference mirroring the PyTorch module."""
    B, n = x.shape
    e = jnp.exp(x.astype(jnp.float32))
    y = labels[indexes]
    same = y[:, None] == labels[None, :]
    e = e.at[jnp.arange(B), indexes].set(0.0)
    p = jnp.sum(jnp.where(same, e, 0.0), axis=1)
    Z = jnp.sum(e, axis=1)
    Z_exclude = Z - p
    p = p / math.exp(margin)
    Z = Z_exclude + p
    prob = p / Z
    nz = prob != 0
    loss = jnp.sum(jnp.where(nz, jnp.log(jnp.where(nz, prob, 1.0)), 0.0))
    return -loss / B


if __name__ == "__main__":
    key = jax.random.PRNGKey(0)
    ks = jax.random.split(key, 8)

    def check(x, indexes, labels, margin, **kw):
        out = jax.block_until_ready(nca_cross_entropy(x, indexes, labels, margin, **kw))
        ref = nca_cross_entropy_ref(x, indexes, labels, margin)
        assert out.shape == ()
        assert bool(jnp.isfinite(out))
        err = jnp.abs(out - ref) / (1.0 + jnp.abs(ref))
        assert float(err) < 2e-4, (float(out), float(ref))

    # Case 1: f32 scores, aligned shapes (everything runs in the kernel).
    B, n, C = 8, 1024, 10
    x = jax.random.normal(ks[0], (B, n), dtype=jnp.float32) * 0.5
    labels = jax.random.randint(ks[1], (n,), 0, C, dtype=jnp.int32)
    indexes = jax.random.choice(ks[2], n, shape=(B,), replace=False).astype(jnp.int32)
    check(x, indexes, labels, 0.0)
    check(x, indexes, labels, 0.5)

    # Case 2: bf16 scores, ragged memory bank (JAX tail) + forced 2-way column split.
    B2, n2, C2 = 16, 1088, 7
    x2 = (jax.random.normal(ks[3], (B2, n2), dtype=jnp.float32) * 0.5).astype(jnp.bfloat16)
    labels2 = jax.random.randint(ks[4], (n2,), 0, C2, dtype=jnp.int32)
    indexes2 = jax.random.choice(ks[5], n2, shape=(B2,), replace=False).astype(jnp.int32)
    check(x2, indexes2, labels2, 0.25, block_n=256)

    # Case 3: batch not a multiple of 8 (ragged row tile, dropped output rows).
    B3, n3, C3 = 10, 512, 5
    x3 = jax.random.normal(ks[6], (B3, n3), dtype=jnp.float32) * 0.5
    labels3 = jax.random.randint(ks[7], (n3,), 0, C3, dtype=jnp.int32)
    indexes3 = jnp.arange(B3, dtype=jnp.int32) * 3
    check(x3, indexes3, labels3, 0.0)

    print("KERNEL_OK")
</pallas_src>

<mosaic_0001>
module attributes {stable_mosaic.version = 11 : i64} {
  func.func @_nca_sums_kernel(%arg0: i32, %arg1: i32, %arg2: i32, %arg3: memref<8x1024xf32, #tpu.memory_space<vmem>>, %arg4: memref<1x1024xi32, #tpu.memory_space<vmem>>, %arg5: memref<8x1xi32, #tpu.memory_space<vmem>>, %arg6: memref<8x256xf32, #tpu.memory_space<vmem>>) attributes {dimension_semantics = [#tpu.dimension_semantics<parallel>, #tpu.dimension_semantics<parallel>, #tpu.dimension_semantics<arbitrary>], iteration_bounds = array<i64: 1, 1, 1>, scalar_prefetch = 0 : i64, scratch_operands = 0 : i64, tpu.core_type = #tpu.core_type<tc>, window_params = [{transform_indices = @transform_0, window_bounds = array<i64: 8, 1024>}, {transform_indices = @transform_1, window_bounds = array<i64: 1, 1024>}, {transform_indices = @transform_2, window_bounds = array<i64: 8, 1>}, {transform_indices = @transform_3, window_bounds = array<i64: 8, 256>}]} {
    %c0_i32 = arith.constant 0 : i32
    %0 = arith.cmpi eq, %arg2, %c0_i32 : i32
    %1 = arith.extui %0 : i1 to i32
    %c0_i32_0 = arith.constant 0 : i32
    %2 = arith.cmpi ne, %1, %c0_i32_0 : i32
    scf.if %2 {
      %cst_13 = arith.constant 0.000000e+00 : f32
      %36 = vector.broadcast %cst_13 : f32 to vector<8x256xf32>
      %c0_14 = arith.constant 0 : index
      %c0_15 = arith.constant 0 : index
      %37 = vector.load %arg6[%c0_14, %c0_15] : memref<8x256xf32, #tpu.memory_space<vmem>>, vector<8x256xf32>
      tpu.vector_store %arg6[%c0_14, %c0_15], %36 {strides = array<i32>} : memref<8x256xf32, #tpu.memory_space<vmem>>, vector<8x256xf32>,
    } else {
    }
    %c0 = arith.constant 0 : index
    %c0_1 = arith.constant 0 : index
    %3 = vector.load %arg3[%c0, %c0_1] : memref<8x1024xf32, #tpu.memory_space<vmem>>, vector<8x1024xf32>
    %c0_2 = arith.constant 0 : index
    %c0_3 = arith.constant 0 : index
    %4 = vector.load %arg4[%c0_2, %c0_3] : memref<1x1024xi32, #tpu.memory_space<vmem>>, vector<1x1024xi32>
    %c0_4 = arith.constant 0 : index
    %c0_5 = arith.constant 0 : index
    %5 = vector.load %arg5[%c0_4, %c0_5] : memref<8x1xi32, #tpu.memory_space<vmem>>, vector<8x1xi32>
    %6 = math.exp %3 : vector<8x1024xf32>
    %7 = vector.broadcast %4 : vector<1x1024xi32> to vector<8x1024xi32>
    %8 = vector.broadcast %5 : vector<8x1xi32> to vector<8x1024xi32>
    %9 = arith.cmpi eq, %7, %8 : vector<8x1024xi32>
    %cst = arith.constant 0.000000e+00 : f32
    %10 = vector.broadcast %cst : f32 to vector<8x1024xf32>
    %11 = arith.select %9, %6, %10 : vector<8x1024xi1>, vector<8x1024xf32>
    %c0_6 = arith.constant 0 : index
    %c0_7 = arith.constant 0 : index
    %12 = vector.load %arg6[%c0_6, %c0_7] : memref<8x256xf32, #tpu.memory_space<vmem>>, vector<8x128xf32>
    %13 = vector.extract_strided_slice %11 {offsets = [0, 0], sizes = [8, 512], strides = [1, 1]} : vector<8x1024xf32> to vector<8x512xf32>
    %14 = vector.extract_strided_slice %11 {offsets = [0, 512], sizes = [8, 512], strides = [1, 1]} : vector<8x1024xf32> to vector<8x512xf32>
    %15 = arith.addf %13, %14 : vector<8x512xf32>
    %16 = vector.extract_strided_slice %15 {offsets = [0, 0], sizes = [8, 256], strides = [1, 1]} : vector<8x512xf32> to vector<8x256xf32>
    %17 = vector.extract_strided_slice %15 {offsets = [0, 256], sizes = [8, 256], strides = [1, 1]} : vector<8x512xf32> to vector<8x256xf32>
    %18 = arith.addf %16, %17 : vector<8x256xf32>
    %19 = vector.extract_strided_slice %18 {offsets = [0, 0], sizes = [8, 128], strides = [1, 1]} : vector<8x256xf32> to vector<8x128xf32>
    %20 = vector.extract_strided_slice %18 {offsets = [0, 128], sizes = [8, 128], strides = [1, 1]} : vector<8x256xf32> to vector<8x128xf32>
    %21 = arith.addf %19, %20 : vector<8x128xf32>
    %22 = arith.addf %12, %21 : vector<8x128xf32>
    %c0_8 = arith.constant 0 : index
    %c0_9 = arith.constant 0 : index
    %23 = vector.load %arg6[%c0_8, %c0_9] : memref<8x256xf32, #tpu.memory_space<vmem>>, vector<8x128xf32>
    tpu.vector_store %arg6[%c0_8, %c0_9], %22 {strides = array<i32>} : memref<8x256xf32, #tpu.memory_space<vmem>>, vector<8x128xf32>,
    %c0_10 = arith.constant 0 : index
    %c128 = arith.constant 128 : index
    %24 = vector.load %arg6[%c0_10, %c128] : memref<8x256xf32, #tpu.memory_space<vmem>>, vector<8x128xf32>
    %25 = vector.extract_strided_slice %6 {offsets = [0, 0], sizes = [8, 512], strides = [1, 1]} : vector<8x1024xf32> to vector<8x512xf32>
    %26 = vector.extract_strided_slice %6 {offsets = [0, 512], sizes = [8, 512], strides = [1, 1]} : vector<8x1024xf32> to vector<8x512xf32>
    %27 = arith.addf %25, %26 : vector<8x512xf32>
    %28 = vector.extract_strided_slice %27 {offsets = [0, 0], sizes = [8, 256], strides = [1, 1]} : vector<8x512xf32> to vector<8x256xf32>
    %29 = vector.extract_strided_slice %27 {offsets = [0, 256], sizes = [8, 256], strides = [1, 1]} : vector<8x512xf32> to vector<8x256xf32>
    %30 = arith.addf %28, %29 : vector<8x256xf32>
    %31 = vector.extract_strided_slice %30 {offsets = [0, 0], sizes = [8, 128], strides = [1, 1]} : vector<8x256xf32> to vector<8x128xf32>
    %32 = vector.extract_strided_slice %30 {offsets = [0, 128], sizes = [8, 128], strides = [1, 1]} : vector<8x256xf32> to vector<8x128xf32>
    %33 = arith.addf %31, %32 : vector<8x128xf32>
    %34 = arith.addf %24, %33 : vector<8x128xf32>
    %c0_11 = arith.constant 0 : index
    %c128_12 = arith.constant 128 : index
    %35 = vector.load %arg6[%c0_11, %c128_12] : memref<8x256xf32, #tpu.memory_space<vmem>>, vector<8x128xf32>
    tpu.vector_store %arg6[%c0_11, %c128_12], %34 {strides = array<i32>} : memref<8x256xf32, #tpu.memory_space<vmem>>, vector<8x128xf32>,
    return
  }
  func.func @transform_0(%arg0: i32, %arg1: i32, %arg2: i32) -> (i32, i32) {
    %c1_i32 = arith.constant 1 : i32
    %0 = arith.muli %arg0, %c1_i32 : i32
    %1 = arith.addi %0, %arg2 : i32
    %c0_i32 = arith.constant 0 : i32
    return %arg1, %1 : i32, i32
  }
  func.func @transform_1(%arg0: i32, %arg1: i32, %arg2: i32) -> (i32, i32) {
    %c1_i32 = arith.constant 1 : i32
    %0 = arith.muli %arg0, %c1_i32 : i32
    %1 = arith.addi %0, %arg2 : i32
    %c0_i32 = arith.constant 0 : i32
    %c0_i32_0 = arith.constant 0 : i32
    return %c0_i32, %1 : i32, i32
  }
  func.func @transform_2(%arg0: i32, %arg1: i32, %arg2: i32) -> (i32, i32) {
    %c0_i32 = arith.constant 0 : i32
    %c0_i32_0 = arith.constant 0 : i32
    return %arg1, %c0_i32 : i32, i32
  }
  func.func @transform_3(%arg0: i32, %arg1: i32, %arg2: i32) -> (i32, i32) {
    %c0_i32 = arith.constant 0 : i32
    return %arg1, %arg0 : i32, i32
  }
}

</mosaic_0001>

<bundles_post_ra>
// kernel: tpu_custom_call.1
= control target key start
LH: loop header
LB: loop body
LE: loop exit
PB: predicated region body
PF: predicated region fallthrough
CT: control target
= control target key end

     0   :  { %8 = vsyncpa [#allocation3], 0  ;;  %s295_s0 = inlined_call_operand.hbm [shape: f32[8,1024], index: 0, kind: input, shape index: {}]   ;;  %s296_s1 = inlined_call_operand.vmem [shape: s32[1,1024], index: 1, kind: input, shape index: {}]   ;;  %s297_s2 = inlined_call_operand.vmem [shape: s32[8,1], index: 2, kind: input, shape index: {}]   ;;  %s298_s3 = inlined_call_operand.hbm [shape: f32[8,256], index: 3, kind: output, shape index: {}]  }
   0x1   :  { %9 = vsyncpa [#allocation4], 0  ;;  %s242_s12 = smov [#allocation2]   ;;  %s194_s16 = scalar_lea.hbm %s295_s0, 1024 }
   0x2   :  { %s20_s13 = sshll.u32 %s242_s12, 4  ;;  %p195_p0 = scmp.ne.s32.totalorder %s295_s0, %s194_s16  ;;  %s21_s13 = int_to_ptr.vmem [resolvable:$true] %s20_s13 }
   0x3   :  { %p198_p1 = scmp.lt.u32.totalorder %s194_s16, %s295_s0 }
   0x5   :  { %p200_p2 = pnand %p198_p1, %p195_p0 }
   0x7   :  { %203 = shalt.err (!%p200_p2)
}
   0x8   :  { %s204_s21 = scalar_lea.vmem %s21_s13, 1024  ;;  %p209_p4 = scmp.lt.s32.totalorder %s21_s13, %s21_s13 }
   0x9   :  { %p205_p3 = scmp.ne.s32.totalorder %s21_s13, %s204_s21  ;;  %p210_p5 = scmp.lt.s32.totalorder %s204_s21, %s204_s21 }
   0xb   :  { %p211_p6 = por %p210_p5, %p209_p4 }
   0xd   :  { %p212_p7 = pnand %p211_p6, %p205_p3 }
   0xf   :  { %215 = shalt.err (!%p212_p7)
}
  0x10   :  { %23 = dma.hbm_to_vmem [thread:$0]  %s295_s0, 1024, %s21_s13, [#allocation3]  }
  0x11   :  { %238 = dma.done.wait [#allocation3], 1024  }
  0x12   :  { %239 = vsyncadd [#allocation3], 4294966272  ;;  %v243_v0 = vmov 0   ;;  %v67_v1 = vld [vmem:[%s297_s2] sm:$0xff]  ;;  %v59_v3 = vld [vmem:[#allocation2 + $0x8] sm:$0xff]  ;;  %v84_v33 = vlaneseq }
  0x13   :  { %177 = vset.pattern.permute.xlu0 %v243_v0  ;;  %v58_v2 = vld [vmem:[#allocation2] sm:$0xff]  ;;  %v60_v4 = vld [vmem:[#allocation2 + $0x10] sm:$0xff]  ;;  %v61_v5 = vld [vmem:[#allocation2 + $0x18] sm:$0xff]  ;;  %v70_v9 = vmul.f32 1.442695, %v59_v3 }
  0x14   :  { %117 = vperm.xlu0 %177, %v67_v1   ;;  %v62_v6 = vld [vmem:[#allocation2 + $0x20] sm:$0xff]  ;;  %v63_v7 = vld [vmem:[#allocation2 + $0x28] sm:$0xff]  ;;  %v68_v8 = vmul.f32 1.442695, %v58_v2  ;;  %v64_v10 = vld [vmem:[#allocation2 + $0x30] sm:$0xff]  ;;  %v85_v34 = vshrl.u32 %v84_v33, 7 }
  0x15   :  { %v72_v11 = vmul.f32 1.442695, %v60_v4  ;;  %v74_v12 = vmul.f32 1.442695, %v61_v5  ;;  %v65_v13 = vld [vmem:[#allocation2 + $0x38] sm:$0xff]  ;;  %v66_v43 = vld [vmem:[%s296_s1] sm:$0xff] }
  0x16   :  { %178 = vpow2.f32 %v68_v8  ;;  %v76_v14 = vmul.f32 1.442695, %v62_v6  ;;  %v78_v15 = vmul.f32 1.442695, %v63_v7  ;;  %v80_v16 = vmul.f32 1.442695, %v64_v10 }
  0x17   :  { %180 = vpow2.f32 %v70_v9  ;;  %v82_v17 = vmul.f32 1.442695, %v65_v13  ;;  %v86_v35 = vsub.s32 0, %v85_v34  ;;  %v90_v36 = vsub.s32 1, %v85_v34  ;;  %s244_s1 = smov [#allocation5]  }
  0x18   :  { %182 = vpow2.f32 %v72_v11  ;;  %v94_v37 = vsub.s32 2, %v85_v34  ;;  %v98_v38 = vsub.s32 3, %v85_v34  ;;  %v102_v39 = vsub.s32 4, %v85_v34  ;;  %s161_s26 = sshll.u32 %s244_s1, 4  ;;  %s162_s26 = int_to_ptr.vmem [resolvable:$true] %s161_s26 }
  0x19   :  { %184 = vpow2.f32 %v74_v12  ;;  %v106_v40 = vsub.s32 5, %v85_v34  ;;  %v110_v41 = vsub.s32 6, %v85_v34  ;;  %v114_v42 = vsub.s32 7, %v85_v34  ;;  %s216_s27 = scalar_lea.vmem %s162_s26, 256  ;;  %p221_p9 = scmp.lt.s32.totalorder %s162_s26, %s162_s26 }
  0x1a   :  { %186 = vpow2.f32 %v76_v14  ;;  %v87_v44 = vrot.slane %v66_v43, %v86_v35  ;;  %v91_v45 = vrot.slane %v66_v43, %v90_v36  ;;  %v95_v46 = vrot.slane %v66_v43, %v94_v37  ;;  %p217_p8 = scmp.ne.s32.totalorder %s162_s26, %s216_s27  ;;  %p222_p10 = scmp.lt.s32.totalorder %s216_s27, %s216_s27 }
  0x1b   :  { %188 = vpow2.f32 %v78_v15  ;;  %v99_v47 = vrot.slane %v66_v43, %v98_v38  ;;  %v103_v48 = vrot.slane %v66_v43, %v102_v39  ;;  %v107_v49 = vrot.slane %v66_v43, %v106_v40 }
  0x1c   :  { %190 = vpow2.f32 %v80_v16  ;;  %v111_v50 = vrot.slane %v66_v43, %v110_v41  ;;  %v115_v51 = vrot.slane %v66_v43, %v114_v42  ;;  %p223_p11 = por %p222_p10, %p221_p9 }
  0x1d   :  { %192 = vpow2.f32 %v82_v17 }
  0x1e   :  { %p224_p12 = pnand %p223_p11, %p217_p8 }
  0x20   :  { %v179_v18 = vpop.eup %178 }
  0x21   :  { %v181_v19 = vpop.eup %180 }
  0x22   :  { %v183_v20 = vpop.eup %182 }
  0x23   :  { %v185_v21 = vpop.eup %184 }
  0x24   :  { %v187_v22 = vpop.eup %186 }
  0x25   :  { %v189_v23 = vpop.eup %188  ;;  %v146_v24 = vadd.f32 %v187_v22, %v179_v18 }
  0x26   :  { %v191_v25 = vpop.eup %190  ;;  %v147_v26 = vadd.f32 %v189_v23, %v181_v19 }
  0x27   :  { %v193_v27 = vpop.eup %192  ;;  %v148_v28 = vadd.f32 %v191_v25, %v183_v20 }
  0x28   :  { %v149_v29 = vadd.f32 %v193_v27, %v185_v21 }
  0x29   :  { %v150_v30 = vadd.f32 %v148_v28, %v146_v24 }
  0x2a   :  { %v151_v31 = vadd.f32 %v149_v29, %v147_v26 }
  0x2c   :  { %v152_v32 = vadd.f32 %v151_v31, %v150_v30 }
  0x2e   :  { %154 = vst [vmem:[#allocation5 + $0x8] sm:$0xff] %v152_v32 }
  0x93   :  { %v118_v52 = vpop.permute.xlu0 %117 }
  0x94   :  { %vm119_vm0 = vcmp.eq.s32.totalorder %v87_v44, %v118_v52  ;;  %vm120_vm1 = vcmp.eq.s32.totalorder %v91_v45, %v118_v52  ;;  %vm121_vm2 = vcmp.eq.s32.totalorder %v95_v46, %v118_v52  ;;  %vm122_vm3 = vcmp.eq.s32.totalorder %v99_v47, %v118_v52 }
  0x95   :  { %vm123_vm4 = vcmp.eq.s32.totalorder %v103_v48, %v118_v52  ;;  %vm124_vm5 = vcmp.eq.s32.totalorder %v107_v49, %v118_v52  ;;  %vm125_vm6 = vcmp.eq.s32.totalorder %v111_v50, %v118_v52  ;;  %vm126_vm7 = vcmp.eq.s32.totalorder %v115_v51, %v118_v52 }
  0x96   :  { %v127_v53 = vsel %vm119_vm0, %v179_v18, 0.0  ;;  %v128_v54 = vsel %vm120_vm1, %v181_v19, 0.0  ;;  %v129_v55 = vsel %vm121_vm2, %v183_v20, 0.0  ;;  %v130_v56 = vsel %vm122_vm3, %v185_v21, 0.0 }
  0x97   :  { %v131_v57 = vsel %vm123_vm4, %v187_v22, 0.0  ;;  %v132_v58 = vsel %vm124_vm5, %v189_v23, 0.0  ;;  %v133_v59 = vsel %vm125_vm6, %v191_v25, 0.0  ;;  %v134_v60 = vsel %vm126_vm7, %v193_v27, 0.0 }
  0x98   :  { %v136_v61 = vadd.f32 %v131_v57, %v127_v53  ;;  %v137_v62 = vadd.f32 %v132_v58, %v128_v54  ;;  %v138_v63 = vadd.f32 %v133_v59, %v129_v55  ;;  %v139_v0 = vadd.f32 %v134_v60, %v130_v56 }
  0x9a   :  { %v140_v1 = vadd.f32 %v138_v63, %v136_v61  ;;  %v141_v2 = vadd.f32 %v139_v0, %v137_v62 }
  0x9c   :  { %v142_v3 = vadd.f32 %v141_v2, %v140_v1 }
  0x9e   :  { %144 = vst [vmem:[#allocation5] sm:$0xff] %v142_v3 }
  0x9f   :  { %227 = shalt.err (!%p224_p12)
}
  0xa0   :  { %s228_s30 = scalar_lea.hbm %s298_s3, 256 }
  0xa1   :  { %p229_p13 = scmp.ne.s32.totalorder %s298_s3, %s228_s30  ;;  %p232_p0 = scmp.lt.u32.totalorder %s228_s30, %s298_s3 }
  0xa3   :  { %p234_p1 = pnand %p232_p0, %p229_p13 }
  0xa5   :  { %237 = shalt.err (!%p234_p1)
}
  0xa6   :  { %164 = dma.vmem_to_hbm [thread:$0]  %s162_s26, 256, %s298_s3, [#allocation4]  }
  0xa7   :  { %240 = dma.done.wait [#allocation4], 256  }
  0xa8   :  { %241 = vsyncadd [#allocation4], 4294967040 }
  0xa9   :  { %168 = vsyncpa [#allocation3], 1 }
  0xaa   :  { %169 = vsyncpa [#allocation4], 1 }

</bundles_post_ra>
